<compile_context>
chip_gen: v7x
topology: tpu7x:2x2x1
jax: 0.10.0
libtpu: 0.0.40
codegen_flags: <defaults>
</compile_context>

<pallas_src>
import functools

import jax
import jax.numpy as jnp
from jax import lax
from jax.experimental import pallas as pl
from jax.experimental.pallas import tpu as pltpu

HIDDEN = 32   # nn.LSTM(hidden_size=32); 4*HIDDEN == 128 == one lane tile
LANE = 128


def _round_up(x, m):
    return (x + m - 1) // m * m


def _choose_batch_blocking(B, batch_block):
    """Pick (bb, n_b, B_pad): bb multiple of 8, small padding, >=2 blocks if B>8."""
    n_b = max(pl.cdiv(B, batch_block), 2 if B > 8 else 1)
    bb = _round_up(pl.cdiv(B, n_b), 8)
    return bb, n_b, bb * n_b


def _lstm_fc_kernel(x_ref, wih_ref, b_ref, whh_ref, wfc_ref, bfc_ref,
                    out_ref, xg_ref, *, seq_len):
    """Full LSTM recurrence + fc head for one batch block, single grid step.

    x_ref  : (T, bb, C)    time-major inputs for this batch block
    wih_ref: (C, 4H)       W_ih^T
    b_ref  : (1, 4H)       b_ih + b_hh
    whh_ref: (H, 4H)       W_hh^T
    wfc_ref: (H, 128)      W_fc^T zero-padded to a lane tile (col 0 real)
    bfc_ref: (1, 128)      b_fc zero-padded
    out_ref: (bb, 128)     column 0 holds fc(h_T)
    xg_ref : (T*bb, 4H)    VMEM scratch: precomputed x-gates (bias folded in)
    """
    H = HIDDEN
    bb = out_ref.shape[0]
    C = x_ref.shape[-1]

    # One large-M MXU matmul for ALL timesteps' x-projection, bias folded in
    # once.  Parked in VMEM scratch so it does not occupy vregs across the
    # sequential loop.
    x_all = x_ref[...].reshape(seq_len * bb, C)          # collapse leading dims
    xg_ref[...] = (jnp.dot(x_all, wih_ref[...],
                           preferred_element_type=jnp.float32) + b_ref[...])

    whh = whh_ref[...]                                    # loop-invariant (H, 4H)

    h0 = jnp.zeros((bb, H), jnp.float32)
    c0 = jnp.zeros((bb, H), jnp.float32)

    def step(t, carry):
        h, c = carry
        off = pl.multiple_of(t * bb, bb)                  # bb is a multiple of 8
        xg_t = xg_ref[pl.ds(off, bb), :]                  # (bb, 4H)
        # Only the recurrent half of the matmul stays on the serial chain.
        gates = xg_t + jnp.dot(h, whh, preferred_element_type=jnp.float32)
        # One full-width (bb, 128) sigmoid; tanh only on the g slice.
        sig = jax.nn.sigmoid(gates)
        i_g = sig[:, 0:H]
        f_g = sig[:, H:2 * H]
        o_g = sig[:, 3 * H:4 * H]
        g_g = jnp.tanh(gates[:, 2 * H:3 * H])
        c = f_g * c + i_g * g_g
        h = o_g * jnp.tanh(c)
        return (h, c)

    unroll = min(8, seq_len)
    h_T, _ = lax.fori_loop(0, seq_len, step, (h0, c0), unroll=unroll)

    # Fused fc head -> lane-dense (bb, 128) store (real result in column 0).
    out_ref[...] = (jnp.dot(h_T, wfc_ref[...], preferred_element_type=jnp.float32)
                    + bfc_ref[...])


def fpl_predictor_pallas(x, params, *, batch_block=64):
    """x: (B, T, C) float32, PyTorch batch_first convention. Returns (B, 1)."""
    B, T, C = x.shape
    H = HIDDEN

    bb, n_b, B_pad = _choose_batch_blocking(B, batch_block)

    x_tm = jnp.transpose(x, (1, 0, 2)).astype(jnp.float32)          # (T, B, C)
    if B_pad != B:
        x_tm = jnp.pad(x_tm, ((0, 0), (0, B_pad - B), (0, 0)))

    # Weights: transposed once in the wrapper; biases pre-summed.
    w_ih_t = params["w_ih"].T.astype(jnp.float32)                    # (C, 4H)
    w_hh_t = params["w_hh"].T.astype(jnp.float32)                    # (H, 4H)
    b = (params["b_ih"] + params["b_hh"]).reshape(1, 4 * H).astype(jnp.float32)

    # FC head padded to a full 128-lane tile; column 0 is the real output.
    wfc = jnp.zeros((H, LANE), jnp.float32).at[:, 0].set(
        params["w_fc"].reshape(H).astype(jnp.float32))
    bfc = jnp.zeros((1, LANE), jnp.float32).at[0, 0].set(
        params["b_fc"].reshape(()).astype(jnp.float32))

    kernel = functools.partial(_lstm_fc_kernel, seq_len=T)

    out = pl.pallas_call(
        kernel,
        out_shape=jax.ShapeDtypeStruct((B_pad, LANE), jnp.float32),
        grid=(n_b,),
        in_specs=[
            pl.BlockSpec((T, bb, C), lambda i: (0, i, 0)),           # x (time-major)
            pl.BlockSpec((C, 4 * H), lambda i: (0, 0)),              # W_ih^T
            pl.BlockSpec((1, 4 * H), lambda i: (0, 0)),              # bias
            pl.BlockSpec((H, 4 * H), lambda i: (0, 0)),              # W_hh^T
            pl.BlockSpec((H, LANE), lambda i: (0, 0)),               # W_fc (padded)
            pl.BlockSpec((1, LANE), lambda i: (0, 0)),               # b_fc (padded)
        ],
        out_specs=pl.BlockSpec((bb, LANE), lambda i: (i, 0)),
        scratch_shapes=[pltpu.VMEM((T * bb, 4 * H), jnp.float32)],   # x-gates
        compiler_params=pltpu.CompilerParams(
            dimension_semantics=("parallel",)),   # independent batch blocks
    )(x_tm, w_ih_t, b, w_hh_t, wfc, bfc)

    return out[:B, :1]


def fpl_predictor_ref(x, params):
    """Pure-JAX reference mirroring torch.nn.LSTM(batch_first) + Linear."""
    B, T, C = x.shape
    w_ih, w_hh = params["w_ih"], params["w_hh"]
    b = params["b_ih"] + params["b_hh"]
    H = HIDDEN

    def step(carry, x_t):
        h, c = carry
        gates = x_t @ w_ih.T + h @ w_hh.T + b
        i = jax.nn.sigmoid(gates[:, 0:H])
        f = jax.nn.sigmoid(gates[:, H:2 * H])
        g = jnp.tanh(gates[:, 2 * H:3 * H])
        o = jax.nn.sigmoid(gates[:, 3 * H:4 * H])
        c = f * c + i * g
        h = o * jnp.tanh(c)
        return (h, c), None

    h0 = jnp.zeros((B, H), jnp.float32)
    c0 = jnp.zeros((B, H), jnp.float32)
    (h_T, _), _ = jax.lax.scan(step, (h0, c0), jnp.transpose(x, (1, 0, 2)))
    return h_T @ params["w_fc"].T + params["b_fc"]


def init_params(key, num_channels):
    """Deterministic init; shapes match nn.LSTM(num_channels, 32) + nn.Linear(32, 1)."""
    k = 1.0 / jnp.sqrt(jnp.float32(HIDDEN))
    keys = jax.random.split(key, 6)
    u = lambda kk, shape: jax.random.uniform(kk, shape, jnp.float32, -k, k)
    return {
        "w_ih": u(keys[0], (4 * HIDDEN, num_channels)),
        "w_hh": u(keys[1], (4 * HIDDEN, HIDDEN)),
        "b_ih": u(keys[2], (4 * HIDDEN,)),
        "b_hh": u(keys[3], (4 * HIDDEN,)),
        "w_fc": u(keys[4], (1, HIDDEN)),
        "b_fc": u(keys[5], (1,)),
    }


if __name__ == "__main__":
    B, T, C = 2, 8, 4  # batch, seq_len, num_channels
    key = jax.random.PRNGKey(0)
    kx, kp = jax.random.split(key)
    x = jax.random.normal(kx, (B, T, C), jnp.float32)
    params = init_params(kp, C)

    out = jax.block_until_ready(fpl_predictor_pallas(x, params))
    ref = jax.block_until_ready(fpl_predictor_ref(x, params))

    assert out.shape == (B, 1), out.shape
    assert jnp.allclose(out, ref, atol=1e-4, rtol=1e-4), (out, ref)
    print("KERNEL_OK")
</pallas_src>

<mosaic_0001>
module attributes {stable_mosaic.version = 11 : i64} {
  func.func @_lstm_fc_kernel(%arg0: i32, %arg1: memref<8x8x4xf32, #tpu.memory_space<vmem>>, %arg2: memref<4x128xf32, #tpu.memory_space<vmem>>, %arg3: memref<1x128xf32, #tpu.memory_space<vmem>>, %arg4: memref<32x128xf32, #tpu.memory_space<vmem>>, %arg5: memref<32x128xf32, #tpu.memory_space<vmem>>, %arg6: memref<1x128xf32, #tpu.memory_space<vmem>>, %arg7: memref<8x128xf32, #tpu.memory_space<vmem>>, %arg8: memref<64x128xf32, #tpu.memory_space<vmem>>) attributes {dimension_semantics = [#tpu.dimension_semantics<parallel>], iteration_bounds = array<i64: 1>, scalar_prefetch = 0 : i64, scratch_operands = 1 : i64, tpu.core_type = #tpu.core_type<tc>, window_params = [{transform_indices = @transform_0, window_bounds = array<i64: 8, 8, 4>}, {pipeline_mode = #tpu.pipeline_mode<synchronous>, transform_indices = @transform_1, window_bounds = array<i64: 4, 128>}, {pipeline_mode = #tpu.pipeline_mode<synchronous>, transform_indices = @transform_2, window_bounds = array<i64: 1, 128>}, {pipeline_mode = #tpu.pipeline_mode<synchronous>, transform_indices = @transform_3, window_bounds = array<i64: 32, 128>}, {pipeline_mode = #tpu.pipeline_mode<synchronous>, transform_indices = @transform_4, window_bounds = array<i64: 32, 128>}, {pipeline_mode = #tpu.pipeline_mode<synchronous>, transform_indices = @transform_5, window_bounds = array<i64: 1, 128>}, {transform_indices = @transform_6, window_bounds = array<i64: 8, 128>}]} {
    %c0 = arith.constant 0 : index
    %c0_0 = arith.constant 0 : index
    %c0_1 = arith.constant 0 : index
    %0 = vector.load %arg1[%c0, %c0_0, %c0_1] : memref<8x8x4xf32, #tpu.memory_space<vmem>>, vector<8x8x4xf32>
    %1 = vector.shape_cast %0 : vector<8x8x4xf32> to vector<64x4xf32>
    %c0_2 = arith.constant 0 : index
    %c0_3 = arith.constant 0 : index
    %2 = vector.load %arg2[%c0_2, %c0_3] : memref<4x128xf32, #tpu.memory_space<vmem>>, vector<4x128xf32>
    %cst = arith.constant dense<0.000000e+00> : vector<64x128xf32>
    %3 = tpu.matmul %1, %2, %cst {dimension_numbers = #tpu.dot_dimension_numbers<[1], [0], [0], [1], [0, 0, 1, 1], [], []>} : vector<64x4xf32>, vector<4x128xf32>, vector<64x128xf32> -> vector<64x128xf32>
    %c0_4 = arith.constant 0 : index
    %c0_5 = arith.constant 0 : index
    %4 = vector.load %arg3[%c0_4, %c0_5] : memref<1x128xf32, #tpu.memory_space<vmem>>, vector<1x128xf32>
    %5 = vector.broadcast %4 : vector<1x128xf32> to vector<64x128xf32>
    %6 = arith.addf %3, %5 : vector<64x128xf32>
    %c0_6 = arith.constant 0 : index
    %c0_7 = arith.constant 0 : index
    %7 = vector.load %arg8[%c0_6, %c0_7] : memref<64x128xf32, #tpu.memory_space<vmem>>, vector<64x128xf32>
    tpu.vector_store %arg8[%c0_6, %c0_7], %6 {strides = array<i32>} : memref<64x128xf32, #tpu.memory_space<vmem>>, vector<64x128xf32>,
    %c0_8 = arith.constant 0 : index
    %c0_9 = arith.constant 0 : index
    %8 = vector.load %arg4[%c0_8, %c0_9] : memref<32x128xf32, #tpu.memory_space<vmem>>, vector<32x128xf32>
    %cst_10 = arith.constant 0.000000e+00 : f32
    %9 = vector.broadcast %cst_10 : f32 to vector<8x32xf32>
    %cst_11 = arith.constant 0.000000e+00 : f32
    %10 = vector.broadcast %cst_11 : f32 to vector<8x32xf32>
    %c0_i32 = arith.constant 0 : i32
    %c8_i32 = arith.constant 8 : i32
    %11 = arith.muli %c0_i32, %c8_i32 : i32
    %12 = tpu.assume_multiple %11, 8 : i32
    %13 = arith.index_cast %12 : i32 to index
    %c0_12 = arith.constant 0 : index
    %14 = vector.load %arg8[%13, %c0_12] : memref<64x128xf32, #tpu.memory_space<vmem>>, vector<8x128xf32>
    %cst_13 = arith.constant dense<0.000000e+00> : vector<8x128xf32>
    %15 = tpu.matmul %9, %8, %cst_13 {dimension_numbers = #tpu.dot_dimension_numbers<[1], [0], [0], [1], [0, 0, 1, 1], [], []>} : vector<8x32xf32>, vector<32x128xf32>, vector<8x128xf32> -> vector<8x128xf32>
    %16 = arith.addf %14, %15 : vector<8x128xf32>
    %17 = arith.negf %16 : vector<8x128xf32>
    %18 = math.exp %17 : vector<8x128xf32>
    %cst_14 = arith.constant 1.000000e+00 : f32
    %19 = vector.broadcast %cst_14 : f32 to vector<8x128xf32>
    %20 = arith.addf %19, %18 : vector<8x128xf32>
    %21 = arith.divf %19, %20 : vector<8x128xf32>
    %22 = vector.extract_strided_slice %21 {offsets = [0, 0], sizes = [8, 32], strides = [1, 1]} : vector<8x128xf32> to vector<8x32xf32>
    %23 = vector.extract_strided_slice %21 {offsets = [0, 32], sizes = [8, 32], strides = [1, 1]} : vector<8x128xf32> to vector<8x32xf32>
    %24 = vector.extract_strided_slice %21 {offsets = [0, 96], sizes = [8, 32], strides = [1, 1]} : vector<8x128xf32> to vector<8x32xf32>
    %25 = vector.extract_strided_slice %16 {offsets = [0, 64], sizes = [8, 32], strides = [1, 1]} : vector<8x128xf32> to vector<8x32xf32>
    %26 = math.tanh %25 : vector<8x32xf32>
    %27 = arith.mulf %23, %10 : vector<8x32xf32>
    %28 = arith.mulf %22, %26 : vector<8x32xf32>
    %29 = arith.addf %27, %28 : vector<8x32xf32>
    %30 = math.tanh %29 : vector<8x32xf32>
    %31 = arith.mulf %24, %30 : vector<8x32xf32>
    %c1_i32 = arith.constant 1 : i32
    %c8_i32_15 = arith.constant 8 : i32
    %32 = arith.muli %c1_i32, %c8_i32_15 : i32
    %33 = tpu.assume_multiple %32, 8 : i32
    %34 = arith.index_cast %33 : i32 to index
    %c0_16 = arith.constant 0 : index
    %35 = vector.load %arg8[%34, %c0_16] : memref<64x128xf32, #tpu.memory_space<vmem>>, vector<8x128xf32>
    %cst_17 = arith.constant dense<0.000000e+00> : vector<8x128xf32>
    %36 = tpu.matmul %31, %8, %cst_17 {dimension_numbers = #tpu.dot_dimension_numbers<[1], [0], [0], [1], [0, 0, 1, 1], [], []>} : vector<8x32xf32>, vector<32x128xf32>, vector<8x128xf32> -> vector<8x128xf32>
    %37 = arith.addf %35, %36 : vector<8x128xf32>
    %38 = arith.negf %37 : vector<8x128xf32>
    %39 = math.exp %38 : vector<8x128xf32>
    %cst_18 = arith.constant 1.000000e+00 : f32
    %40 = vector.broadcast %cst_18 : f32 to vector<8x128xf32>
    %41 = arith.addf %40, %39 : vector<8x128xf32>
    %42 = arith.divf %40, %41 : vector<8x128xf32>
    %43 = vector.extract_strided_slice %42 {offsets = [0, 0], sizes = [8, 32], strides = [1, 1]} : vector<8x128xf32> to vector<8x32xf32>
    %44 = vector.extract_strided_slice %42 {offsets = [0, 32], sizes = [8, 32], strides = [1, 1]} : vector<8x128xf32> to vector<8x32xf32>
    %45 = vector.extract_strided_slice %42 {offsets = [0, 96], sizes = [8, 32], strides = [1, 1]} : vector<8x128xf32> to vector<8x32xf32>
    %46 = vector.extract_strided_slice %37 {offsets = [0, 64], sizes = [8, 32], strides = [1, 1]} : vector<8x128xf32> to vector<8x32xf32>
    %47 = math.tanh %46 : vector<8x32xf32>
    %48 = arith.mulf %44, %29 : vector<8x32xf32>
    %49 = arith.mulf %43, %47 : vector<8x32xf32>
    %50 = arith.addf %48, %49 : vector<8x32xf32>
    %51 = math.tanh %50 : vector<8x32xf32>
    %52 = arith.mulf %45, %51 : vector<8x32xf32>
    %c2_i32 = arith.constant 2 : i32
    %c8_i32_19 = arith.constant 8 : i32
    %53 = arith.muli %c2_i32, %c8_i32_19 : i32
    %54 = tpu.assume_multiple %53, 8 : i32
    %55 = arith.index_cast %54 : i32 to index
    %c0_20 = arith.constant 0 : index
    %56 = vector.load %arg8[%55, %c0_20] : memref<64x128xf32, #tpu.memory_space<vmem>>, vector<8x128xf32>
    %cst_21 = arith.constant dense<0.000000e+00> : vector<8x128xf32>
    %57 = tpu.matmul %52, %8, %cst_21 {dimension_numbers = #tpu.dot_dimension_numbers<[1], [0], [0], [1], [0, 0, 1, 1], [], []>} : vector<8x32xf32>, vector<32x128xf32>, vector<8x128xf32> -> vector<8x128xf32>
    %58 = arith.addf %56, %57 : vector<8x128xf32>
    %59 = arith.negf %58 : vector<8x128xf32>
    %60 = math.exp %59 : vector<8x128xf32>
    %cst_22 = arith.constant 1.000000e+00 : f32
    %61 = vector.broadcast %cst_22 : f32 to vector<8x128xf32>
    %62 = arith.addf %61, %60 : vector<8x128xf32>
    %63 = arith.divf %61, %62 : vector<8x128xf32>
    %64 = vector.extract_strided_slice %63 {offsets = [0, 0], sizes = [8, 32], strides = [1, 1]} : vector<8x128xf32> to vector<8x32xf32>
    %65 = vector.extract_strided_slice %63 {offsets = [0, 32], sizes = [8, 32], strides = [1, 1]} : vector<8x128xf32> to vector<8x32xf32>
    %66 = vector.extract_strided_slice %63 {offsets = [0, 96], sizes = [8, 32], strides = [1, 1]} : vector<8x128xf32> to vector<8x32xf32>
    %67 = vector.extract_strided_slice %58 {offsets = [0, 64], sizes = [8, 32], strides = [1, 1]} : vector<8x128xf32> to vector<8x32xf32>
    %68 = math.tanh %67 : vector<8x32xf32>
    %69 = arith.mulf %65, %50 : vector<8x32xf32>
    %70 = arith.mulf %64, %68 : vector<8x32xf32>
    %71 = arith.addf %69, %70 : vector<8x32xf32>
    %72 = math.tanh %71 : vector<8x32xf32>
    %73 = arith.mulf %66, %72 : vector<8x32xf32>
    %c3_i32 = arith.constant 3 : i32
    %c8_i32_23 = arith.constant 8 : i32
    %74 = arith.muli %c3_i32, %c8_i32_23 : i32
    %75 = tpu.assume_multiple %74, 8 : i32
    %76 = arith.index_cast %75 : i32 to index
    %c0_24 = arith.constant 0 : index
    %77 = vector.load %arg8[%76, %c0_24] : memref<64x128xf32, #tpu.memory_space<vmem>>, vector<8x128xf32>
    %cst_25 = arith.constant dense<0.000000e+00> : vector<8x128xf32>
    %78 = tpu.matmul %73, %8, %cst_25 {dimension_numbers = #tpu.dot_dimension_numbers<[1], [0], [0], [1], [0, 0, 1, 1], [], []>} : vector<8x32xf32>, vector<32x128xf32>, vector<8x128xf32> -> vector<8x128xf32>
    %79 = arith.addf %77, %78 : vector<8x128xf32>
    %80 = arith.negf %79 : vector<8x128xf32>
    %81 = math.exp %80 : vector<8x128xf32>
    %cst_26 = arith.constant 1.000000e+00 : f32
    %82 = vector.broadcast %cst_26 : f32 to vector<8x128xf32>
    %83 = arith.addf %82, %81 : vector<8x128xf32>
    %84 = arith.divf %82, %83 : vector<8x128xf32>
    %85 = vector.extract_strided_slice %84 {offsets = [0, 0], sizes = [8, 32], strides = [1, 1]} : vector<8x128xf32> to vector<8x32xf32>
    %86 = vector.extract_strided_slice %84 {offsets = [0, 32], sizes = [8, 32], strides = [1, 1]} : vector<8x128xf32> to vector<8x32xf32>
    %87 = vector.extract_strided_slice %84 {offsets = [0, 96], sizes = [8, 32], strides = [1, 1]} : vector<8x128xf32> to vector<8x32xf32>
    %88 = vector.extract_strided_slice %79 {offsets = [0, 64], sizes = [8, 32], strides = [1, 1]} : vector<8x128xf32> to vector<8x32xf32>
    %89 = math.tanh %88 : vector<8x32xf32>
    %90 = arith.mulf %86, %71 : vector<8x32xf32>
    %91 = arith.mulf %85, %89 : vector<8x32xf32>
    %92 = arith.addf %90, %91 : vector<8x32xf32>
    %93 = math.tanh %92 : vector<8x32xf32>
    %94 = arith.mulf %87, %93 : vector<8x32xf32>
    %c4_i32 = arith.constant 4 : i32
    %c8_i32_27 = arith.constant 8 : i32
    %95 = arith.muli %c4_i32, %c8_i32_27 : i32
    %96 = tpu.assume_multiple %95, 8 : i32
    %97 = arith.index_cast %96 : i32 to index
    %c0_28 = arith.constant 0 : index
    %98 = vector.load %arg8[%97, %c0_28] : memref<64x128xf32, #tpu.memory_space<vmem>>, vector<8x128xf32>
    %cst_29 = arith.constant dense<0.000000e+00> : vector<8x128xf32>
    %99 = tpu.matmul %94, %8, %cst_29 {dimension_numbers = #tpu.dot_dimension_numbers<[1], [0], [0], [1], [0, 0, 1, 1], [], []>} : vector<8x32xf32>, vector<32x128xf32>, vector<8x128xf32> -> vector<8x128xf32>
    %100 = arith.addf %98, %99 : vector<8x128xf32>
    %101 = arith.negf %100 : vector<8x128xf32>
    %102 = math.exp %101 : vector<8x128xf32>
    %cst_30 = arith.constant 1.000000e+00 : f32
    %103 = vector.broadcast %cst_30 : f32 to vector<8x128xf32>
    %104 = arith.addf %103, %102 : vector<8x128xf32>
    %105 = arith.divf %103, %104 : vector<8x128xf32>
    %106 = vector.extract_strided_slice %105 {offsets = [0, 0], sizes = [8, 32], strides = [1, 1]} : vector<8x128xf32> to vector<8x32xf32>
    %107 = vector.extract_strided_slice %105 {offsets = [0, 32], sizes = [8, 32], strides = [1, 1]} : vector<8x128xf32> to vector<8x32xf32>
    %108 = vector.extract_strided_slice %105 {offsets = [0, 96], sizes = [8, 32], strides = [1, 1]} : vector<8x128xf32> to vector<8x32xf32>
    %109 = vector.extract_strided_slice %100 {offsets = [0, 64], sizes = [8, 32], strides = [1, 1]} : vector<8x128xf32> to vector<8x32xf32>
    %110 = math.tanh %109 : vector<8x32xf32>
    %111 = arith.mulf %107, %92 : vector<8x32xf32>
    %112 = arith.mulf %106, %110 : vector<8x32xf32>
    %113 = arith.addf %111, %112 : vector<8x32xf32>
    %114 = math.tanh %113 : vector<8x32xf32>
    %115 = arith.mulf %108, %114 : vector<8x32xf32>
    %c5_i32 = arith.constant 5 : i32
    %c8_i32_31 = arith.constant 8 : i32
    %116 = arith.muli %c5_i32, %c8_i32_31 : i32
    %117 = tpu.assume_multiple %116, 8 : i32
    %118 = arith.index_cast %117 : i32 to index
    %c0_32 = arith.constant 0 : index
    %119 = vector.load %arg8[%118, %c0_32] : memref<64x128xf32, #tpu.memory_space<vmem>>, vector<8x128xf32>
    %cst_33 = arith.constant dense<0.000000e+00> : vector<8x128xf32>
    %120 = tpu.matmul %115, %8, %cst_33 {dimension_numbers = #tpu.dot_dimension_numbers<[1], [0], [0], [1], [0, 0, 1, 1], [], []>} : vector<8x32xf32>, vector<32x128xf32>, vector<8x128xf32> -> vector<8x128xf32>
    %121 = arith.addf %119, %120 : vector<8x128xf32>
    %122 = arith.negf %121 : vector<8x128xf32>
    %123 = math.exp %122 : vector<8x128xf32>
    %cst_34 = arith.constant 1.000000e+00 : f32
    %124 = vector.broadcast %cst_34 : f32 to vector<8x128xf32>
    %125 = arith.addf %124, %123 : vector<8x128xf32>
    %126 = arith.divf %124, %125 : vector<8x128xf32>
    %127 = vector.extract_strided_slice %126 {offsets = [0, 0], sizes = [8, 32], strides = [1, 1]} : vector<8x128xf32> to vector<8x32xf32>
    %128 = vector.extract_strided_slice %126 {offsets = [0, 32], sizes = [8, 32], strides = [1, 1]} : vector<8x128xf32> to vector<8x32xf32>
    %129 = vector.extract_strided_slice %126 {offsets = [0, 96], sizes = [8, 32], strides = [1, 1]} : vector<8x128xf32> to vector<8x32xf32>
    %130 = vector.extract_strided_slice %121 {offsets = [0, 64], sizes = [8, 32], strides = [1, 1]} : vector<8x128xf32> to vector<8x32xf32>
    %131 = math.tanh %130 : vector<8x32xf32>
    %132 = arith.mulf %128, %113 : vector<8x32xf32>
    %133 = arith.mulf %127, %131 : vector<8x32xf32>
    %134 = arith.addf %132, %133 : vector<8x32xf32>
    %135 = math.tanh %134 : vector<8x32xf32>
    %136 = arith.mulf %129, %135 : vector<8x32xf32>
    %c6_i32 = arith.constant 6 : i32
    %c8_i32_35 = arith.constant 8 : i32
    %137 = arith.muli %c6_i32, %c8_i32_35 : i32
    %138 = tpu.assume_multiple %137, 8 : i32
    %139 = arith.index_cast %138 : i32 to index
    %c0_36 = arith.constant 0 : index
    %140 = vector.load %arg8[%139, %c0_36] : memref<64x128xf32, #tpu.memory_space<vmem>>, vector<8x128xf32>
    %cst_37 = arith.constant dense<0.000000e+00> : vector<8x128xf32>
    %141 = tpu.matmul %136, %8, %cst_37 {dimension_numbers = #tpu.dot_dimension_numbers<[1], [0], [0], [1], [0, 0, 1, 1], [], []>} : vector<8x32xf32>, vector<32x128xf32>, vector<8x128xf32> -> vector<8x128xf32>
    %142 = arith.addf %140, %141 : vector<8x128xf32>
    %143 = arith.negf %142 : vector<8x128xf32>
    %144 = math.exp %143 : vector<8x128xf32>
    %cst_38 = arith.constant 1.000000e+00 : f32
    %145 = vector.broadcast %cst_38 : f32 to vector<8x128xf32>
    %146 = arith.addf %145, %144 : vector<8x128xf32>
    %147 = arith.divf %145, %146 : vector<8x128xf32>
    %148 = vector.extract_strided_slice %147 {offsets = [0, 0], sizes = [8, 32], strides = [1, 1]} : vector<8x128xf32> to vector<8x32xf32>
    %149 = vector.extract_strided_slice %147 {offsets = [0, 32], sizes = [8, 32], strides = [1, 1]} : vector<8x128xf32> to vector<8x32xf32>
    %150 = vector.extract_strided_slice %147 {offsets = [0, 96], sizes = [8, 32], strides = [1, 1]} : vector<8x128xf32> to vector<8x32xf32>
    %151 = vector.extract_strided_slice %142 {offsets = [0, 64], sizes = [8, 32], strides = [1, 1]} : vector<8x128xf32> to vector<8x32xf32>
    %152 = math.tanh %151 : vector<8x32xf32>
    %153 = arith.mulf %149, %134 : vector<8x32xf32>
    %154 = arith.mulf %148, %152 : vector<8x32xf32>
    %155 = arith.addf %153, %154 : vector<8x32xf32>
    %156 = math.tanh %155 : vector<8x32xf32>
    %157 = arith.mulf %150, %156 : vector<8x32xf32>
    %c7_i32 = arith.constant 7 : i32
    %c8_i32_39 = arith.constant 8 : i32
    %158 = arith.muli %c7_i32, %c8_i32_39 : i32
    %159 = tpu.assume_multiple %158, 8 : i32
    %160 = arith.index_cast %159 : i32 to index
    %c0_40 = arith.constant 0 : index
    %161 = vector.load %arg8[%160, %c0_40] : memref<64x128xf32, #tpu.memory_space<vmem>>, vector<8x128xf32>
    %cst_41 = arith.constant dense<0.000000e+00> : vector<8x128xf32>
    %162 = tpu.matmul %157, %8, %cst_41 {dimension_numbers = #tpu.dot_dimension_numbers<[1], [0], [0], [1], [0, 0, 1, 1], [], []>} : vector<8x32xf32>, vector<32x128xf32>, vector<8x128xf32> -> vector<8x128xf32>
    %163 = arith.addf %161, %162 : vector<8x128xf32>
    %164 = arith.negf %163 : vector<8x128xf32>
    %165 = math.exp %164 : vector<8x128xf32>
    %cst_42 = arith.constant 1.000000e+00 : f32
    %166 = vector.broadcast %cst_42 : f32 to vector<8x128xf32>
    %167 = arith.addf %166, %165 : vector<8x128xf32>
    %168 = arith.divf %166, %167 : vector<8x128xf32>
    %169 = vector.extract_strided_slice %168 {offsets = [0, 0], sizes = [8, 32], strides = [1, 1]} : vector<8x128xf32> to vector<8x32xf32>
    %170 = vector.extract_strided_slice %168 {offsets = [0, 32], sizes = [8, 32], strides = [1, 1]} : vector<8x128xf32> to vector<8x32xf32>
    %171 = vector.extract_strided_slice %168 {offsets = [0, 96], sizes = [8, 32], strides = [1, 1]} : vector<8x128xf32> to vector<8x32xf32>
    %172 = vector.extract_strided_slice %163 {offsets = [0, 64], sizes = [8, 32], strides = [1, 1]} : vector<8x128xf32> to vector<8x32xf32>
    %173 = math.tanh %172 : vector<8x32xf32>
    %174 = arith.mulf %170, %155 : vector<8x32xf32>
    %175 = arith.mulf %169, %173 : vector<8x32xf32>
    %176 = arith.addf %174, %175 : vector<8x32xf32>
    %177 = math.tanh %176 : vector<8x32xf32>
    %178 = arith.mulf %171, %177 : vector<8x32xf32>
    %c8_i32_43 = arith.constant 8 : i32
    %c0_44 = arith.constant 0 : index
    %c0_45 = arith.constant 0 : index
    %179 = vector.load %arg5[%c0_44, %c0_45] : memref<32x128xf32, #tpu.memory_space<vmem>>, vector<32x128xf32>
    %cst_46 = arith.constant dense<0.000000e+00> : vector<8x128xf32>
    %180 = tpu.matmul %178, %179, %cst_46 {dimension_numbers = #tpu.dot_dimension_numbers<[1], [0], [0], [1], [0, 0, 1, 1], [], []>} : vector<8x32xf32>, vector<32x128xf32>, vector<8x128xf32> -> vector<8x128xf32>
    %c0_47 = arith.constant 0 : index
    %c0_48 = arith.constant 0 : index
    %181 = vector.load %arg6[%c0_47, %c0_48] : memref<1x128xf32, #tpu.memory_space<vmem>>, vector<1x128xf32>
    %182 = vector.broadcast %181 : vector<1x128xf32> to vector<8x128xf32>
    %183 = arith.addf %180, %182 : vector<8x128xf32>
    %c0_49 = arith.constant 0 : index
    %c0_50 = arith.constant 0 : index
    %184 = vector.load %arg7[%c0_49, %c0_50] : memref<8x128xf32, #tpu.memory_space<vmem>>, vector<8x128xf32>
    tpu.vector_store %arg7[%c0_49, %c0_50], %183 {strides = array<i32>} : memref<8x128xf32, #tpu.memory_space<vmem>>, vector<8x128xf32>,
    return
  }
  func.func @transform_0(%arg0: i32) -> (i32, i32, i32) {
    %c0_i32 = arith.constant 0 : i32
    %c0_i32_0 = arith.constant 0 : i32
    %c0_i32_1 = arith.constant 0 : i32
    return %c0_i32, %arg0, %c0_i32_0 : i32, i32, i32
  }
  func.func @transform_1(%arg0: i32) -> (i32, i32) {
    %c0_i32 = arith.constant 0 : i32
    %c0_i32_0 = arith.constant 0 : i32
    %c0_i32_1 = arith.constant 0 : i32
    return %c0_i32, %c0_i32_0 : i32, i32
  }
  func.func @transform_2(%arg0: i32) -> (i32, i32) {
    %c0_i32 = arith.constant 0 : i32
    %c0_i32_0 = arith.constant 0 : i32
    %c0_i32_1 = arith.constant 0 : i32
    return %c0_i32, %c0_i32_0 : i32, i32
  }
  func.func @transform_3(%arg0: i32) -> (i32, i32) {
    %c0_i32 = arith.constant 0 : i32
    %c0_i32_0 = arith.constant 0 : i32
    %c0_i32_1 = arith.constant 0 : i32
    return %c0_i32, %c0_i32_0 : i32, i32
  }
  func.func @transform_4(%arg0: i32) -> (i32, i32) {
    %c0_i32 = arith.constant 0 : i32
    %c0_i32_0 = arith.constant 0 : i32
    %c0_i32_1 = arith.constant 0 : i32
    return %c0_i32, %c0_i32_0 : i32, i32
  }
  func.func @transform_5(%arg0: i32) -> (i32, i32) {
    %c0_i32 = arith.constant 0 : i32
    %c0_i32_0 = arith.constant 0 : i32
    %c0_i32_1 = arith.constant 0 : i32
    return %c0_i32, %c0_i32_0 : i32, i32
  }
  func.func @transform_6(%arg0: i32) -> (i32, i32) {
    %c0_i32 = arith.constant 0 : i32
    %c0_i32_0 = arith.constant 0 : i32
    return %arg0, %c0_i32 : i32, i32
  }
}

</mosaic_0001>

<bundles_post_ra>
// kernel: tpu_custom_call.1
= control target key start
LH: loop header
LB: loop body
LE: loop exit
PB: predicated region body
PF: predicated region fallthrough
CT: control target
= control target key end

     0   :  { %vm65_vm0 = vcmask 1043456   ;;  %v1443_v3 = vmov 0.0|0.0   ;;  %vm40_vm1 = vcmask 31744   ;;  %s1680_s0 = inlined_call_operand.vmem [shape: f32[8,8,4], index: 0, kind: input, shape index: {}]   ;;  %s1681_s1 = inlined_call_operand.vmem [shape: f32[4,128], index: 1, kind: input, shape index: {}]   ;;  %s1682_s2 = inlined_call_operand.vmem [shape: f32[1,128], index: 2, kind: input, shape index: {}]   ;;  %s1683_s3 = inlined_call_operand.vmem [shape: f32[32,128], index: 3, kind: input, shape index: {}]   ;;  %s1684_s4 = inlined_call_operand.vmem [shape: f32[32,128], index: 4, kind: input, shape index: {}]   ;;  %s1685_s5 = inlined_call_operand.vmem [shape: f32[1,128], index: 5, kind: input, shape index: {}]   ;;  %s1686_s6 = inlined_call_operand.hbm [shape: f32[8,128], index: 6, kind: output, shape index: {}]  }
   0x1   :  { %v182_v0 = vld [vmem:[%s1683_s3] sm:$0xff]  ;;  %v183_v1 = vld [vmem:[%s1683_s3 + $0x8] sm:$0xff]  ;;  %1295 = vmatprep.subr.bf16.mxu1 %v1443_v3  ;;  %v184_v7 = vld [vmem:[%s1683_s3 + $0x10] sm:$0xff] }
   0x2   :  { %v32_v2 = vld [vmem:[%s1681_s1] sm:$0xf]  ;;  %v1494_v4 = vpack.c.bf16 %v183_v1, %v182_v0  ;;  %v25_v6 = vld [vmem:[%s1680_s0 + $0x8] sm:$0xff]  ;;  %v185_v8 = vld [vmem:[%s1683_s3 + $0x18] sm:$0xff] }
   0x3   :  { %1182 = vmatprep.subr.msk.mxu0 %vm65_vm0, %v32_v2  ;;  %v24_v5 = vld [vmem:[%s1680_s0] sm:$0xff] }
   0x4   :  { %1183 = vmatpush3.msk.msra.mxu0 %vm65_vm0, %v32_v2  ;;  %1184 = vmatprep.mubr.msk.f32.mxu0 %vm40_vm1, %v24_v5 }
   0x5   :  { %11 = vsyncpa [#allocation4], 0  ;;  %1297 = vmatpush3.bf16.msra.mxu1 %v1494_v4  ;;  %1185 = vmatmul.mubr.msk.f32.vlgmr.msra.gmra.mrb[0].mxu0 %vm40_vm1, %v25_v6  ;;  %v1511_v9 = vpack.c.bf16 %v185_v8, %v184_v7  ;;  %vm1444_vm2 = vmmov 0   ;;  %v1445_v10 = vmov 0.0   ;;  %v1533_v12 = vld [vmem:[%s1682_s2] ss:$0 sm:$0xff] }
   0x6   :  { %1298 = vmatprep.subr.bf16.mxu1 %v1443_v3  ;;  %1204 = vmatprep.mubr.msk.f32.mxu1 %vm1444_vm2, %v1445_v10  ;;  %s1446_s11 = smov 64   ;;  %s1447_s2 = smov 32   ;;  %vm187_vm3 = vcmask 261120   ;;  %v26_v46 = vld [vmem:[%s1680_s0 + $0x10] sm:$0xff]  ;;  %v27_v47 = vld [vmem:[%s1680_s0 + $0x18] sm:$0xff]  ;;  %v28_v48 = vld [vmem:[%s1680_s0 + $0x20] sm:$0xff] }
   0x7   :  { %1307 = vmatprep.subr.bf16.mxu0 %v1443_v3  ;;  %1187 = vmatprep.mubr.msk.f32.mxu0 %vm40_vm1, %v26_v46  ;;  %v29_v49 = vld [vmem:[%s1680_s0 + $0x28] sm:$0xff]  ;;  %v30_v50 = vld [vmem:[%s1680_s0 + $0x30] sm:$0xff]  ;;  %v31_v51 = vld [vmem:[%s1680_s0 + $0x38] sm:$0xff] }
   0x8   :  { %1309 = vmatpush3.bf16.msra.mxu0 %v1494_v4 }
   0x9   :  { %1300 = vmatpush3.bf16.msra.mxu1 %v1511_v9  ;;  %1310 = vmatprep.subr.bf16.mxu0 %v1443_v3 }
   0xa   :  { %1301 = vmatprep.subr.bf16.mxu1 %v1443_v3  ;;  %1188 = vmatmul.mubr.msk.f32.gmra.mrb[2].mxu0 %vm40_vm1, %v27_v47 }
   0xb   :  { %1190 = vmatprep.mubr.msk.f32.mxu0 %vm40_vm1, %v28_v48 }
   0xc   :  { %1205 = vmatmul.mubr.f32.vlgmr.msra.gmra.mrb[0].mxu1 %v1445_v10  ;;  %1312 = vmatpush3.bf16.msra.mxu0 %v1511_v9 }
   0xd   :  { %1303 = vmatpush3.bf16.msra.mxu1 %v1494_v4  ;;  %1215 = vmatprep.mubr.msk.f32.mxu1 %vm1444_vm2, %v1445_v10 }
   0xe   :  { %1304 = vmatprep.subr.bf16.mxu1 %v1443_v3  ;;  %1319 = vmatprep.subr.bf16.mxu0 %v1443_v3 }
   0xf   :  { %1191 = vmatmul.mubr.msk.f32.gmra.mrb[4].mxu0 %vm40_vm1, %v29_v49 }
  0x10   :  { %1193 = vmatprep.mubr.msk.f32.mxu0 %vm40_vm1, %v30_v50 }
  0x11   :  { %1306 = vmatpush3.bf16.msra.mxu1 %v1511_v9 }
  0x12   :  { %1313 = vmatprep.subr.bf16.mxu1 %v1443_v3 }
  0x13   :  { %1194 = vmatmul.mubr.msk.f32.gmra.mrb[6].mxu0 %vm40_vm1, %v31_v51 }
  0x14   :  { %1226 = vmatprep.mubr.msk.f32.mxu0 %vm1444_vm2, %v1445_v10 }
  0xd8   :  { %v1186_v11 = vpop.f32.mrb[0].mxu0 }
  0xd9   :  { %v135_v13 = vpop.f32.mrb[1].mxu0  ;;  %v141_v32 = vadd.f32 %v1186_v11, %v1533_v12 }
  0xda   :  { %v136_v14 = vadd.f32 %v1533_v12, %v135_v13 }
  0xdd   :  { %v1189_v55 = vpop.f32.mrb[2].mxu0 }
  0xde   :  { %v145_v56 = vpop.f32.mrb[3].mxu0 }
  0xdf   :  { %v257_v15 = vpop.f32.mrb[0].mxu1  ;;  %v146_v62 = vadd.f32 %v1533_v12, %v145_v56 }
  0xe0   :  { %v261_v16 = vadd.f32 %v257_v15, %v136_v14  ;;  %v1206_v17 = vpop.f32.mrb[1].mxu1 }
  0xe2   :  { %1355 = vtanh.f32 %v261_v16  ;;  %v1111_v19 = vmul.f32 -1.442695, %v261_v16  ;;  %v1578_v57 = vpop.f32.mrb[4].mxu0 }
  0xe3   :  { %v1580_v58 = vpop.f32.mrb[5].mxu0 }
  0xe4   :  { %1357 = vpow2.f32 %v1111_v19 }
  0xe6   :  { %v1582_v59 = vpop.f32.mrb[6].mxu0 }
  0xe7   :  { %v1584_v60 = vpop.f32.mrb[7].mxu0 }
  0xec   :  { %v1356_v18 = vpop.eup %1355 }
  0xed   :  { %271 = vrot.lane.b32.xlu0 %v1356_v18, %s1446_s11 }
  0xee   :  { %v1358_v20 = vpop.eup %1357 }
  0xef   :  { %v265_v21 = vadd.f32 1.0, %v1358_v20 }
  0xf1   :  { %1359 = vrcp.f32 %v265_v21  ;;  %v151_v21 = vadd.f32 %v1189_v55, %v1533_v12 }
  0xfb   :  { %v1360_v22 = vpop.eup %1359 }
  0xfc   :  { %v269_v25 = vmul.f32 0.0, %v1360_v22 }
 0x15f   :  { %v272_v23 = vpop.permute.xlu0 %271 }
 0x160   :  { %v274_v24 = vmul.f32 %v1360_v22, %v272_v23 }
 0x162   :  { %276 = vrot.lane.b32.xlu0 %v274_v24, %s1447_s2 }
 0x1d4   :  { %v277_v26 = vpop.permute.xlu0 %276 }
 0x1d5   :  { %v279_v27 = vadd.f32 %v277_v26, %v269_v25 }
 0x1d7   :  { %1361 = vtanh.f32 %v279_v27 }
 0x1e1   :  { %v1362_v28 = vpop.eup %1361 }
 0x1e2   :  { %282 = vrot.lane.b32.xlu1 %v1362_v28, %s1446_s11 }
 0x254   :  { %v283_v29 = vpop.permute.xlu1 %282 }
 0x255   :  { %v285_v30 = vmul.f32 %v1360_v22, %v283_v29 }
 0x257   :  { %289 = vrot.lane.b32.xlu1 %v285_v30, %s1447_s2 }
 0x2c9   :  { %v290_v31 = vpop.permute.xlu1 %289 }
 0x2ca   :  { %1216 = vmatmul.mubr.msk.f32.vlgmr.msra.gmra.mrb[2].mxu1 %vm187_vm3, %v290_v31 }
 0x2cb   :  { %1315 = vmatpush3.bf16.msra.mxu1 %v1494_v4  ;;  %1237 = vmatprep.mubr.msk.f32.mxu1 %vm1444_vm2, %v1445_v10 }
 0x2cc   :  { %1316 = vmatprep.subr.bf16.mxu1 %v1443_v3 }
 0x2cf   :  { %1318 = vmatpush3.bf16.msra.mxu1 %v1511_v9 }
 0x2d0   :  { %1325 = vmatprep.subr.bf16.mxu1 %v1443_v3 }
 0x39d   :  { %v359_v33 = vpop.f32.mrb[2].mxu1 }
 0x39e   :  { %v363_v34 = vadd.f32 %v359_v33, %v141_v32  ;;  %v1217_v35 = vpop.f32.mrb[3].mxu1 }
 0x3a0   :  { %1363 = vtanh.f32 %v363_v34  ;;  %v1113_v37 = vmul.f32 -1.442695, %v363_v34 }
 0x3a2   :  { %1365 = vpow2.f32 %v1113_v37 }
 0x3aa   :  { %v1364_v36 = vpop.eup %1363 }
 0x3ab   :  { %373 = vrot.lane.b32.xlu0 %v1364_v36, %s1446_s11 }
 0x3ac   :  { %v1366_v38 = vpop.eup %1365 }
 0x3ad   :  { %v367_v39 = vadd.f32 1.0, %v1366_v38 }
 0x3af   :  { %1367 = vrcp.f32 %v367_v39  ;;  %v156_v39 = vadd.f32 %v1533_v12, %v1580_v58  ;;  %v161_v58 = vadd.f32 %v1578_v57, %v1533_v12 }
 0x3b9   :  { %v1368_v40 = vpop.eup %1367 }
 0x3ba   :  { %v371_v43 = vmul.f32 %v1368_v40, %v279_v27 }
 0x41d   :  { %v374_v41 = vpop.permute.xlu0 %373 }
 0x41e   :  { %v376_v42 = vmul.f32 %v1368_v40, %v374_v41 }
 0x420   :  { %378 = vrot.lane.b32.xlu1 %v376_v42, %s1447_s2 }
 0x492   :  { %v379_v44 = vpop.permute.xlu1 %378 }
 0x493   :  { %v381_v45 = vadd.f32 %v379_v44, %v371_v43 }
 0x495   :  { %1369 = vtanh.f32 %v381_v45 }
 0x49f   :  { %v1370_v52 = vpop.eup %1369 }
 0x4a0   :  { %384 = vrot.lane.b32.xlu0 %v1370_v52, %s1446_s11 }
 0x512   :  { %v385_v53 = vpop.permute.xlu0 %384 }
 0x513   :  { %v387_v54 = vmul.f32 %v1368_v40, %v385_v53 }
 0x515   :  { %391 = vrot.lane.b32.xlu1 %v387_v54, %s1447_s2 }
 0x587   :  { %v392_v61 = vpop.permute.xlu1 %391 }
 0x588   :  { %1227 = vmatmul.mubr.msk.f32.vlgmr.msra.gmra.mrb[8].mxu0 %vm187_vm3, %v392_v61 }
 0x589   :  { %1321 = vmatpush3.bf16.msra.mxu0 %v1494_v4  ;;  %1248 = vmatprep.mubr.msk.f32.mxu0 %vm1444_vm2, %v1445_v10 }
 0x58a   :  { %1322 = vmatprep.subr.bf16.mxu0 %v1443_v3 }
 0x58d   :  { %1324 = vmatpush3.bf16.msra.mxu0 %v1511_v9 }
 0x58e   :  { %1331 = vmatprep.subr.bf16.mxu0 %v1443_v3 }
 0x65b   :  { %v461_v63 = vpop.f32.mrb[8].mxu0 }
 0x65c   :  { %v465_v0 = vadd.f32 %v461_v63, %v146_v62  ;;  %v1228_v1 = vpop.f32.mrb[9].mxu0 }
 0x65e   :  { %1371 = vtanh.f32 %v465_v0  ;;  %v1115_v5 = vmul.f32 -1.442695, %v465_v0 }
 0x660   :  { %1373 = vpow2.f32 %v1115_v5 }
 0x668   :  { %v1372_v2 = vpop.eup %1371 }
 0x669   :  { %475 = vrot.lane.b32.xlu0 %v1372_v2, %s1446_s11 }
 0x66a   :  { %v1374_v6 = vpop.eup %1373 }
 0x66b   :  { %v469_v7 = vadd.f32 1.0, %v1374_v6 }
 0x66d   :  { %1375 = vrcp.f32 %v469_v7 }
 0x677   :  { %v1376_v8 = vpop.eup %1375 }
 0x678   :  { %v473_v14 = vmul.f32 %v1376_v8, %v381_v45 }
 0x6db   :  { %v476_v11 = vpop.permute.xlu0 %475 }
 0x6dc   :  { %v478_v13 = vmul.f32 %v1376_v8, %v476_v11 }
 0x6de   :  { %480 = vrot.lane.b32.xlu1 %v478_v13, %s1447_s2 }
 0x750   :  { %v481_v15 = vpop.permute.xlu1 %480 }
 0x751   :  { %v483_v16 = vadd.f32 %v481_v15, %v473_v14 }
 0x753   :  { %1377 = vtanh.f32 %v483_v16 }
 0x75d   :  { %v1378_v17 = vpop.eup %1377 }
 0x75e   :  { %486 = vrot.lane.b32.xlu0 %v1378_v17, %s1446_s11 }
 0x7d0   :  { %v487_v18 = vpop.permute.xlu0 %486 }
 0x7d1   :  { %v489_v19 = vmul.f32 %v1376_v8, %v487_v18 }
 0x7d3   :  { %493 = vrot.lane.b32.xlu1 %v489_v19, %s1447_s2 }
 0x845   :  { %v494_v20 = vpop.permute.xlu1 %493 }
 0x846   :  { %1238 = vmatmul.mubr.msk.f32.vlgmr.msra.gmra.mrb[4].mxu1 %vm187_vm3, %v494_v20 }
 0x847   :  { %1327 = vmatpush3.bf16.msra.mxu1 %v1494_v4  ;;  %1259 = vmatprep.mubr.msk.f32.mxu1 %vm1444_vm2, %v1445_v10 }
 0x848   :  { %1328 = vmatprep.subr.bf16.mxu1 %v1443_v3 }
 0x84b   :  { %1330 = vmatpush3.bf16.msra.mxu1 %v1511_v9 }
 0x84c   :  { %1337 = vmatprep.subr.bf16.mxu1 %v1443_v3 }
 0x919   :  { %v563_v22 = vpop.f32.mrb[4].mxu1 }
 0x91a   :  { %v567_v23 = vadd.f32 %v563_v22, %v151_v21  ;;  %v1239_v24 = vpop.f32.mrb[5].mxu1 }
 0x91c   :  { %1379 = vtanh.f32 %v567_v23  ;;  %v1117_v26 = vmul.f32 -1.442695, %v567_v23 }
 0x91e   :  { %1381 = vpow2.f32 %v1117_v26 }
 0x926   :  { %v1380_v25 = vpop.eup %1379 }
 0x927   :  { %577 = vrot.lane.b32.xlu0 %v1380_v25, %s1446_s11 }
 0x928   :  { %v1382_v27 = vpop.eup %1381 }
 0x929   :  { %v571_v28 = vadd.f32 1.0, %v1382_v27 }
 0x92b   :  { %1383 = vrcp.f32 %v571_v28 }
 0x935   :  { %v1384_v29 = vpop.eup %1383 }
 0x936   :  { %v575_v32 = vmul.f32 %v1384_v29, %v483_v16  ;;  %v166_v16 = vadd.f32 %v1533_v12, %v1584_v60 }
 0x999   :  { %v578_v30 = vpop.permute.xlu0 %577 }
 0x99a   :  { %v580_v31 = vmul.f32 %v1384_v29, %v578_v30 }
 0x99c   :  { %582 = vrot.lane.b32.xlu1 %v580_v31, %s1447_s2 }
 0xa0e   :  { %v583_v33 = vpop.permute.xlu1 %582 }
 0xa0f   :  { %v585_v34 = vadd.f32 %v583_v33, %v575_v32  ;;  %v171_v32 = vadd.f32 %v1582_v59, %v1533_v12  ;;  %v1000_v59 = vld [vmem:[%s1684_s4] sm:$0xff] }
 0xa11   :  { %1385 = vtanh.f32 %v585_v34 }
 0xa1b   :  { %v1386_v35 = vpop.eup %1385 }
 0xa1c   :  { %588 = vrot.lane.b32.xlu0 %v1386_v35, %s1446_s11 }
 0xa8e   :  { %v589_v36 = vpop.permute.xlu0 %588 }
 0xa8f   :  { %v591_v37 = vmul.f32 %v1384_v29, %v589_v36 }
 0xa91   :  { %595 = vrot.lane.b32.xlu1 %v591_v37, %s1447_s2 }
 0xb03   :  { %v596_v38 = vpop.permute.xlu1 %595 }
 0xb04   :  { %1249 = vmatmul.mubr.msk.f32.vlgmr.msra.gmra.mrb[10].mxu0 %vm187_vm3, %v596_v38 }
 0xb05   :  { %1333 = vmatpush3.bf16.msra.mxu0 %v1494_v4  ;;  %1270 = vmatprep.mubr.msk.f32.mxu0 %vm1444_vm2, %v1445_v10 }
 0xb06   :  { %1334 = vmatprep.subr.bf16.mxu0 %v1443_v3 }
 0xb09   :  { %1336 = vmatpush3.bf16.msra.mxu0 %v1511_v9 }
 0xb0a   :  { %1343 = vmatprep.subr.bf16.mxu0 %v1443_v3 }
 0xbd7   :  { %v665_v40 = vpop.f32.mrb[10].mxu0 }
 0xbd8   :  { %v669_v41 = vadd.f32 %v665_v40, %v156_v39  ;;  %v1250_v42 = vpop.f32.mrb[11].mxu0 }
 0xbda   :  { %1387 = vtanh.f32 %v669_v41  ;;  %v1119_v44 = vmul.f32 -1.442695, %v669_v41 }
 0xbdc   :  { %1389 = vpow2.f32 %v1119_v44 }
 0xbe4   :  { %v1388_v43 = vpop.eup %1387 }
 0xbe5   :  { %679 = vrot.lane.b32.xlu0 %v1388_v43, %s1446_s11 }
 0xbe6   :  { %v1390_v45 = vpop.eup %1389 }
 0xbe7   :  { %v673_v46 = vadd.f32 1.0, %v1390_v45  ;;  %v1001_v45 = vld [vmem:[%s1684_s4 + $0x8] sm:$0xff] }
 0xbe9   :  { %1391 = vrcp.f32 %v673_v46  ;;  %v1002_v46 = vld [vmem:[%s1684_s4 + $0x10] sm:$0xff] }
 0xbf3   :  { %v1392_v47 = vpop.eup %1391 }
 0xbf4   :  { %v677_v50 = vmul.f32 %v1392_v47, %v585_v34 }
 0xc57   :  { %v680_v48 = vpop.permute.xlu0 %679 }
 0xc58   :  { %v682_v49 = vmul.f32 %v1392_v47, %v680_v48  ;;  %v1003_v48 = vld [vmem:[%s1684_s4 + $0x18] sm:$0xff]  ;;  %s1448_s4 = smov [#allocation3]  }
 0xc59   :  { %s1093_s1 = sshll.u32 %s1448_s4, 4  ;;  %s1094_s1 = int_to_ptr.vmem [resolvable:$true] %s1093_s1 }
 0xc5a   :  { %684 = vrot.lane.b32.xlu1 %v682_v49, %s1447_s2  ;;  %v1347_v49 = vpack.c.bf16 %v1003_v48, %v1002_v46  ;;  %s1419_s9 = scalar_lea.vmem %s1094_s1, 128  ;;  %p1424_p1 = scmp.lt.s32.totalorder %s1094_s1, %s1094_s1 }
 0xc5b   :  { %p1420_p0 = scmp.ne.s32.totalorder %s1094_s1, %s1419_s9  ;;  %p1425_p2 = scmp.lt.s32.totalorder %s1419_s9, %s1419_s9 }
 0xc5d   :  { %p1426_p3 = por %p1425_p2, %p1424_p1 }
 0xc5f   :  { %p1427_p4 = pnand %p1426_p3, %p1420_p0 }
 0xccc   :  { %v685_v51 = vpop.permute.xlu1 %684 }
 0xccd   :  { %v687_v52 = vadd.f32 %v685_v51, %v677_v50 }
 0xccf   :  { %1393 = vtanh.f32 %v687_v52 }
 0xcd9   :  { %v1394_v53 = vpop.eup %1393 }
 0xcda   :  { %690 = vrot.lane.b32.xlu0 %v1394_v53, %s1446_s11 }
 0xd4c   :  { %v691_v54 = vpop.permute.xlu0 %690 }
 0xd4d   :  { %v693_v55 = vmul.f32 %v1392_v47, %v691_v54  ;;  %v1344_v47 = vpack.c.bf16 %v1001_v45, %v1000_v59  ;;  %v1126_v54 = vld [vmem:[%s1685_s5] ss:$0 sm:$0xff] }
 0xd4f   :  { %697 = vrot.lane.b32.xlu1 %v693_v55, %s1447_s2 }
 0xdc1   :  { %v698_v56 = vpop.permute.xlu1 %697 }
 0xdc2   :  { %1260 = vmatmul.mubr.msk.f32.vlgmr.msra.gmra.mrb[6].mxu1 %vm187_vm3, %v698_v56 }
 0xdc3   :  { %1339 = vmatpush3.bf16.msra.mxu1 %v1494_v4  ;;  %1281 = vmatprep.mubr.msk.f32.mxu1 %vm1444_vm2, %v1445_v10 }
 0xdc4   :  { %1340 = vmatprep.subr.bf16.mxu1 %v1443_v3 }
 0xdc7   :  { %1342 = vmatpush3.bf16.msra.mxu1 %v1511_v9 }
 0xe95   :  { %v767_v61 = vpop.f32.mrb[6].mxu1 }
 0xe96   :  { %v771_v62 = vadd.f32 %v767_v61, %v161_v58  ;;  %v1261_v63 = vpop.f32.mrb[7].mxu1 }
 0xe98   :  { %1395 = vtanh.f32 %v771_v62  ;;  %v1121_v1 = vmul.f32 -1.442695, %v771_v62 }
 0xe9a   :  { %1397 = vpow2.f32 %v1121_v1 }
 0xea2   :  { %v1396_v0 = vpop.eup %1395 }
 0xea3   :  { %781 = vrot.lane.b32.xlu0 %v1396_v0, %s1446_s11 }
 0xea4   :  { %v1398_v4 = vpop.eup %1397 }
 0xea5   :  { %v775_v2 = vadd.f32 1.0, %v1398_v4 }
 0xea7   :  { %1399 = vrcp.f32 %v775_v2 }
 0xeb1   :  { %v1400_v5 = vpop.eup %1399 }
 0xeb2   :  { %v779_v9 = vmul.f32 %v1400_v5, %v687_v52 }
 0xf15   :  { %v782_v6 = vpop.permute.xlu0 %781 }
 0xf16   :  { %v784_v7 = vmul.f32 %v1400_v5, %v782_v6 }
 0xf18   :  { %786 = vrot.lane.b32.xlu1 %v784_v7, %s1447_s2 }
 0xf8a   :  { %v787_v8 = vpop.permute.xlu1 %786 }
 0xf8b   :  { %v789_v57 = vadd.f32 %v787_v8, %v779_v9 }
 0xf8d   :  { %1401 = vtanh.f32 %v789_v57 }
 0xf97   :  { %v1402_v11 = vpop.eup %1401 }
 0xf98   :  { %792 = vrot.lane.b32.xlu0 %v1402_v11, %s1446_s11 }
0x100a   :  { %v793_v13 = vpop.permute.xlu0 %792 }
0x100b   :  { %v795_v14 = vmul.f32 %v1400_v5, %v793_v13 }
0x100d   :  { %799 = vrot.lane.b32.xlu1 %v795_v14, %s1447_s2 }
0x107f   :  { %v800_v15 = vpop.permute.xlu1 %799 }
0x1080   :  { %1271 = vmatmul.mubr.msk.f32.vlgmr.msra.gmra.mrb[12].mxu0 %vm187_vm3, %v800_v15 }
0x1081   :  { %1292 = vmatprep.mubr.msk.f32.mxu0 %vm1444_vm2, %v1445_v10  ;;  %1345 = vmatpush3.bf16.msra.mxu0 %v1344_v47 }
0x1082   :  { %1346 = vmatprep.subr.bf16.mxu0 %v1443_v3 }
0x1085   :  { %1348 = vmatpush3.bf16.msra.mxu0 %v1347_v49 }
0x1153   :  { %v869_v17 = vpop.f32.mrb[12].mxu0 }
0x1154   :  { %v873_v18 = vadd.f32 %v869_v17, %v166_v16  ;;  %v1272_v19 = vpop.f32.mrb[13].mxu0 }
0x1156   :  { %1403 = vtanh.f32 %v873_v18  ;;  %v1123_v21 = vmul.f32 -1.442695, %v873_v18 }
0x1158   :  { %1405 = vpow2.f32 %v1123_v21 }
0x1160   :  { %v1404_v20 = vpop.eup %1403 }
0x1161   :  { %883 = vrot.lane.b32.xlu0 %v1404_v20, %s1446_s11 }
0x1162   :  { %v1406_v22 = vpop.eup %1405 }
0x1163   :  { %v877_v23 = vadd.f32 1.0, %v1406_v22 }
0x1165   :  { %1407 = vrcp.f32 %v877_v23 }
0x116f   :  { %v1408_v24 = vpop.eup %1407 }
0x1170   :  { %v881_v10 = vmul.f32 %v1408_v24, %v789_v57 }
0x11d3   :  { %v884_v25 = vpop.permute.xlu0 %883 }
0x11d4   :  { %v886_v26 = vmul.f32 %v1408_v24, %v884_v25 }
0x11d6   :  { %888 = vrot.lane.b32.xlu1 %v886_v26, %s1447_s2 }
0x1248   :  { %v889_v27 = vpop.permute.xlu1 %888 }
0x1249   :  { %v891_v60 = vadd.f32 %v889_v27, %v881_v10 }
0x124b   :  { %1409 = vtanh.f32 %v891_v60 }
0x1255   :  { %v1410_v28 = vpop.eup %1409 }
0x1256   :  { %894 = vrot.lane.b32.xlu0 %v1410_v28, %s1446_s11 }
0x12c8   :  { %v895_v29 = vpop.permute.xlu0 %894 }
0x12c9   :  { %v897_v30 = vmul.f32 %v1408_v24, %v895_v29 }
0x12cb   :  { %901 = vrot.lane.b32.xlu1 %v897_v30, %s1447_s2 }
0x133d   :  { %v902_v31 = vpop.permute.xlu1 %901 }
0x133e   :  { %1282 = vmatmul.mubr.msk.f32.vlgmr.msra.gmra.mrb[8].mxu1 %vm187_vm3, %v902_v31 }
0x1411   :  { %v971_v33 = vpop.f32.mrb[8].mxu1 }
0x1412   :  { %v975_v34 = vadd.f32 %v971_v33, %v171_v32  ;;  %v1283_v35 = vpop.f32.mrb[9].mxu1 }
0x1414   :  { %1411 = vtanh.f32 %v975_v34  ;;  %v1125_v37 = vmul.f32 -1.442695, %v975_v34 }
0x1416   :  { %1413 = vpow2.f32 %v1125_v37 }
0x141e   :  { %v1412_v36 = vpop.eup %1411 }
0x141f   :  { %985 = vrot.lane.b32.xlu0 %v1412_v36, %s1446_s11 }
0x1420   :  { %v1414_v38 = vpop.eup %1413 }
0x1421   :  { %v979_v39 = vadd.f32 1.0, %v1414_v38 }
0x1423   :  { %1415 = vrcp.f32 %v979_v39 }
0x142d   :  { %v1416_v40 = vpop.eup %1415 }
0x142e   :  { %v983_v43 = vmul.f32 %v1416_v40, %v891_v60 }
0x1491   :  { %v986_v41 = vpop.permute.xlu0 %985 }
0x1492   :  { %v988_v42 = vmul.f32 %v1416_v40, %v986_v41 }
0x1494   :  { %990 = vrot.lane.b32.xlu1 %v988_v42, %s1447_s2 }
0x1506   :  { %v991_v44 = vpop.permute.xlu1 %990 }
0x1507   :  { %v993_v12 = vadd.f32 %v991_v44, %v983_v43 }
0x1509   :  { %1417 = vtanh.f32 %v993_v12 }
0x1513   :  { %v1418_v50 = vpop.eup %1417 }
0x1514   :  { %996 = vrot.lane.b32.xlu0 %v1418_v50, %s1446_s11 }
0x1586   :  { %v997_v51 = vpop.permute.xlu0 %996 }
0x1587   :  { %v999_v52 = vmul.f32 %v1416_v40, %v997_v51 }
0x1589   :  { %1012 = vrot.lane.b32.xlu1 %v999_v52, %s1447_s2 }
0x15fb   :  { %v1013_v53 = vpop.permute.xlu1 %1012 }
0x15fc   :  { %1293 = vmatmul.mubr.msk.f32.vlgmr.msra.gmra.mrb[14].mxu0 %vm187_vm3, %v1013_v53 }
0x16cf   :  { %v1082_v55 = vpop.f32.mrb[14].mxu0 }
0x16d0   :  { %v1083_v56 = vadd.f32 %v1126_v54, %v1082_v55  ;;  %v1294_v3 = vpop.f32.mrb[15].mxu0 }
0x16d2   :  { %1086 = vst [vmem:[#allocation3] sm:$0xff] %v1083_v56 }
0x16d3   :  { %1430 = shalt.err (!%p1427_p4)
}
0x16d4   :  { %s1431_s11 = scalar_lea.hbm %s1686_s6, 128 }
0x16d5   :  { %p1432_p5 = scmp.ne.s32.totalorder %s1686_s6, %s1431_s11  ;;  %p1435_p6 = scmp.lt.u32.totalorder %s1431_s11, %s1686_s6 }
0x16d7   :  { %p1437_p7 = pnand %p1435_p6, %p1432_p5 }
0x16d9   :  { %1440 = shalt.err (!%p1437_p7)
}
0x16da   :  { %1096 = dma.vmem_to_hbm [thread:$0]  %s1094_s1, 128, %s1686_s6, [#allocation4]  }
0x16db   :  { %1441 = dma.done.wait [#allocation4], 128  }
0x16dc   :  { %1442 = vsyncadd [#allocation4], 4294967168 }
0x16dd   :  { %1100 = vsyncpa [#allocation4], 1 }

</bundles_post_ra>
